<compile_context>
chip_gen: v6e
topology: v6e:2x2x1
jax: 0.10.0
libtpu: 0.0.40
codegen_flags: <defaults>
</compile_context>

<pallas_src>
import numpy as np
import jax
import jax.numpy as jnp
from jax.experimental import pallas as pl
from jax.experimental.pallas import tpu as pltpu

_LANE = 128


# ---------------------------------------------------------------------------
# Pallas kernel: per-batch complex left-matmul, Karatsuba (3-dot) form.
#   (or + i*oi)[b] = (wr + i*wi) @ (xr + i*xi)[b]
# wr/wi/ws (= wr + wi) are window-folded DFT weights, resident in VMEM.
# ---------------------------------------------------------------------------
def _cplx_dft_kernel(wr_ref, wi_ref, ws_ref, xr_ref, xi_ref, or_ref, oi_ref):
    wdt = wr_ref.dtype
    wr = wr_ref[...]                       # (Nout, K)
    wi = wi_ref[...]
    ws = ws_ref[...]
    xr = xr_ref[0]                         # (K, tc)
    xi = xi_ref[0]
    xs = (xr + xi).astype(wdt)             # cast at the MXU input
    xr = xr.astype(wdt)
    xi = xi.astype(wdt)
    t1 = jnp.dot(wr, xr, preferred_element_type=jnp.float32)
    t2 = jnp.dot(wi, xi, preferred_element_type=jnp.float32)
    t3 = jnp.dot(ws, xs, preferred_element_type=jnp.float32)
    or_ref[0] = (t1 - t2).astype(or_ref.dtype)
    oi_ref[0] = (t3 - t1 - t2).astype(oi_ref.dtype)


# ---------------------------------------------------------------------------
# Generation-gated VMEM budgets
# ---------------------------------------------------------------------------
_VMEM_BUDGET_CACHE = None


def _vmem_budgets():
    """Returns (vmem_limit_bytes, pipelined-tile budget bytes)."""
    global _VMEM_BUDGET_CACHE
    if _VMEM_BUDGET_CACHE is None:
        try:
            cap = int(pltpu.get_tpu_info().vmem_capacity_bytes)
        except Exception:                      # unknown runtime: assume v7x-like
            cap = 64 * 1024 * 1024
        if cap >= 100 * 1024 * 1024:           # v5e / v6e: 128 MiB physical VMEM
            limit, budget = 96 << 20, 56 << 20
        else:                                  # v7x: 64 MiB per TensorCore
            limit, budget = 48 << 20, 26 << 20
        limit = min(limit, max((cap * 3) // 4, 16 << 20))
        budget = min(budget, limit // 2)
        _VMEM_BUDGET_CACHE = (limit, budget)
    return _VMEM_BUDGET_CACHE


# ---------------------------------------------------------------------------
# Tile planning (VMEM-budgeted incl. kernel temporaries, lane-aligned, tb = 1)
# ---------------------------------------------------------------------------
def _max_col_tile_from_budget(k, nout, in_isize, out_isize, w_isize, budget):
    w_bytes = 3 * 2 * nout * k * w_isize            # wr/wi/ws (count dbl-buffered)
    per_col = (2 * 2 * k * in_isize                 # xr, xi tiles, double-buffered
               + 2 * 2 * nout * out_isize           # or, oi tiles, double-buffered
               + 4 * nout * 4                       # t1/t2/t3 + epilogue f32 temps
               + k * max(in_isize, w_isize))        # (xr + xi) temporary
    avail = max(budget - w_bytes, 1 << 20)
    return max(avail // per_col, _LANE)


def _pick_col_tile(cols, max_cols):
    if cols <= max_cols:
        return cols                                  # full extent: always legal
    if cols % _LANE == 0:
        best, t = _LANE, _LANE
        while t <= max_cols:
            if cols % t == 0:
                best = t
            t += _LANE
        return best
    # TODO(synk): non-128-aligned cols wider than the VMEM budget; fall back to
    # the full extent (legal but over budget / masked stores).
    return cols


def _refine_col_tile(tc, cols, bdim):
    # Keep >=4 total grid steps, and an even parallel split when the batch dim
    # is odd, so both v7x TensorCores get balanced work and can pipeline DMA.
    while bdim * (cols // tc) < 4 and tc % (2 * _LANE) == 0:
        tc //= 2
    if bdim % 2 == 1 and (cols // tc) % 2 == 1 and tc % (2 * _LANE) == 0:
        tc //= 2
    return tc


def _maybe_pad_cols(xr, xi, cols, max_cols):
    if cols % _LANE == 0:
        return xr, xi, cols
    padded = pl.cdiv(cols, _LANE) * _LANE
    must_pad = cols > max_cols                       # can't tile legally otherwise
    cheap = (cols >= _LANE) and (padded * 4 <= cols * 5)   # <= 25% overhead
    if must_pad or cheap:
        pad = padded - cols
        xr = jnp.pad(xr, ((0, 0), (0, 0), (0, pad)))
        xi = jnp.pad(xi, ((0, 0), (0, 0), (0, pad)))
        return xr, xi, padded
    # TODO(synk): tiny lane width (e.g. small W in layer 2) stays full-extent
    # (masked vst); restructure layer 2 if production W is tiny and perf-critical.
    return xr, xi, cols


def _weight_spec(nout, k):
    # Resident weight (constant index_map); request single buffering to save
    # VMEM (matters most on v7x's 64 MiB).
    try:
        return pl.BlockSpec((nout, k), lambda i, j: (0, 0),
                            pipeline_mode=pl.Buffered(1))
    except Exception:                                # older jax: no pipeline_mode
        return pl.BlockSpec((nout, k), lambda i, j: (0, 0))


# ---------------------------------------------------------------------------
# pallas_call wrapper
# ---------------------------------------------------------------------------
def complex_dft_matmul(wr, wi, ws, xr, xi, *, out_dtype=jnp.float32):
    """Per-batch complex matmul: out[b] = (wr + i wi) @ (xr + i xi)[b].

    wr, wi, ws=wr+wi: (Nout, K), window already folded into the columns.
    xr, xi: (Bdim, K, Cols).  Returns (out_r, out_i): (Bdim, Nout, Cols).
    """
    bdim, k, cols_in = xr.shape
    nout = wr.shape[0]
    vmem_limit, tile_budget = _vmem_budgets()
    max_cols = _max_col_tile_from_budget(
        k, nout, xr.dtype.itemsize, jnp.dtype(out_dtype).itemsize,
        wr.dtype.itemsize, tile_budget)

    xr, xi, cols = _maybe_pad_cols(xr, xi, cols_in, max_cols)
    tc = _pick_col_tile(cols, max_cols)
    tc = _refine_col_tile(tc, cols, bdim)
    grid = (bdim, cols // tc)

    act_spec = pl.BlockSpec((1, k, tc), lambda i, j: (i, 0, j))
    out_spec = pl.BlockSpec((1, nout, tc), lambda i, j: (i, 0, j))
    w_spec = _weight_spec(nout, k)

    out_r, out_i = pl.pallas_call(
        _cplx_dft_kernel,
        out_shape=(jax.ShapeDtypeStruct((bdim, nout, cols), out_dtype),
                   jax.ShapeDtypeStruct((bdim, nout, cols), out_dtype)),
        grid_spec=pltpu.PrefetchScalarGridSpec(
            num_scalar_prefetch=0,
            grid=grid,
            in_specs=[w_spec, w_spec, w_spec, act_spec, act_spec],
            out_specs=(out_spec, out_spec),
        ),
        compiler_params=pltpu.CompilerParams(
            dimension_semantics=("parallel", "parallel"),
            vmem_limit_bytes=vmem_limit),
    )(wr, wi, ws, xr, xi)

    if cols != cols_in:
        out_r = out_r[:, :, :cols_in]
        out_i = out_i[:, :, :cols_in]
    return out_r, out_i


# ---------------------------------------------------------------------------
# Parameter construction (mirrors the PyTorch __init__; window fold, Karatsuba
# sum weight and dtype cast done ONCE here, not per forward call)
# ---------------------------------------------------------------------------
def _make_folded_dft_blocks(n, window, dtype):
    j, k = np.meshgrid(np.arange(n), np.arange(n), indexing="ij")
    dft = np.exp(-2j * np.pi * j * k / n)
    w = np.asarray(window, np.float64).reshape(1, n)
    wr = dft.real * w                               # window folded into columns
    wi = dft.imag * w
    ws = wr + wi                                    # Karatsuba combined weight
    to = lambda a: jnp.asarray(a.astype(np.float32)).astype(dtype)
    return to(wr), to(wi), to(ws)


def make_params(C, H, mxu_dtype=jnp.bfloat16):
    # TODO(synk): the original module loads hanning_window_range/_doppler from
    # .npy files of unknown shape; we synthesize deterministic Hanning windows
    # broadcasting along the range (C) and doppler (H) axes instead.
    w_range = np.hanning(C).astype(np.float32)
    w_doppler = np.hanning(H).astype(np.float32)
    w1r, w1i, w1s = _make_folded_dft_blocks(C, w_range, mxu_dtype)
    w2r, w2i, w2s = _make_folded_dft_blocks(H, w_doppler, mxu_dtype)
    return {
        "w_range": jnp.asarray(w_range),
        "w_doppler": jnp.asarray(w_doppler),
        "w1r": w1r, "w1i": w1i, "w1s": w1s,   # (C, C) range-FFT, window folded
        "w2r": w2r, "w2i": w2i, "w2s": w2s,   # (H, H) doppler-FFT, window folded
    }


# ---------------------------------------------------------------------------
# Forward pass: only contiguous reshapes + two Pallas kernels in the hot path.
# Takes pre-split real/imag parts (no complex de-interleave pass).
# ---------------------------------------------------------------------------
def signal_process_forward(xr, xi, params):
    # xr, xi: (B, C, H, W) f32 (C = range axis, H = doppler axis).
    # The PyTorch .clone().detach().to(complex64) steps are no-ops here.
    B, C, H, W = xr.shape
    inter_dtype = (jnp.bfloat16 if params["w1r"].dtype == jnp.bfloat16
                   else jnp.float32)

    # hamming1 + FirstFFTLinearLayer: out[b,c',h,w] = sum_c W1eff[c',c] x[b,c,h,w]
    yr, yi = complex_dft_matmul(params["w1r"], params["w1i"], params["w1s"],
                                xr.reshape(B, C, H * W),
                                xi.reshape(B, C, H * W),
                                out_dtype=inter_dtype)

    # hamming2 + SecondFFTLinearLayer: out[b,c,h',w] = sum_h W2eff[h',h] y[b,c,h,w]
    # TODO(synk): optionally fuse both layers into one pallas_call per batch
    # slab when a (C, H*W) bf16 slab fits VMEM (removes this HBM round-trip).
    zr, zi = complex_dft_matmul(params["w2r"], params["w2i"], params["w2s"],
                                yr.reshape(B * C, H, W),
                                yi.reshape(B * C, H, W),
                                out_dtype=jnp.float32)

    z = jax.lax.complex(zr, zi).astype(jnp.complex64)
    return z.reshape(B, C, H, W)


def signal_process_forward_complex(x, params):
    # Convenience wrapper matching the PyTorch complex-input signature.
    # TODO(synk): prefer the split (xr, xi) entry point upstream to avoid this
    # extra HBM de-interleave pass.
    return signal_process_forward(jnp.real(x).astype(jnp.float32),
                                  jnp.imag(x).astype(jnp.float32), params)


# ---------------------------------------------------------------------------
# Pure-JAX reference mirroring the PyTorch module (for correctness check only)
# ---------------------------------------------------------------------------
def _make_full_linear_weight(n):
    j, k = np.meshgrid(np.arange(n), np.arange(n), indexing="ij")
    dft = np.exp(-2j * np.pi * j * k / n).astype(np.complex64)
    re, im = dft.real.astype(np.float32), dft.imag.astype(np.float32)
    return jnp.asarray(np.block([[re, -im], [im, re]]).astype(np.float32))


def _ref_forward(x, w_range, w_doppler):
    B, C, H, W = x.shape
    w1 = _make_full_linear_weight(C)
    w2 = _make_full_linear_weight(H)
    hi = jax.lax.Precision.HIGHEST
    xw = x * w_range.reshape(1, C, 1, 1)
    xr = jnp.transpose(xw, (0, 2, 3, 1)).reshape(-1, C)
    comb = jnp.matmul(jnp.concatenate([jnp.real(xr), jnp.imag(xr)], -1),
                      w1.T, precision=hi)
    y = jax.lax.complex(comb[:, :C], comb[:, C:]).reshape(B, H, W, C)
    y = jnp.transpose(y, (0, 3, 1, 2)).astype(jnp.complex64)
    yw = y * w_doppler.reshape(1, 1, H, 1)
    yr = jnp.transpose(yw, (0, 1, 3, 2)).reshape(-1, H)
    comb2 = jnp.matmul(jnp.concatenate([jnp.real(yr), jnp.imag(yr)], -1),
                       w2.T, precision=hi)
    z = jax.lax.complex(comb2[:, :H], comb2[:, H:]).reshape(B, C, W, H)
    return jnp.transpose(z, (0, 1, 3, 2)).astype(jnp.complex64)


if __name__ == "__main__":
    # Small shapes consistent with the module layout:
    #   B=2, C (range / FirstFFT input_size)=16, H (doppler / SecondFFT)=8, W=4
    B, C, H, W = 2, 16, 8, 4
    key = jax.random.PRNGKey(0)
    kr, ki = jax.random.split(key)
    xr = jax.random.normal(kr, (B, C, H, W), jnp.float32)
    xi = jax.random.normal(ki, (B, C, H, W), jnp.float32)
    x_complex = jax.lax.complex(xr, xi).astype(jnp.complex64)   # reference only

    fwd = jax.jit(signal_process_forward)
    ref = np.asarray(_ref_forward(x_complex,
                                  jnp.asarray(np.hanning(C).astype(np.float32)),
                                  jnp.asarray(np.hanning(H).astype(np.float32))))

    # 1) f32-weight path: verifies the Karatsuba 3-matmul algebra tightly.
    params_f32 = make_params(C, H, mxu_dtype=jnp.float32)
    out_f32 = jax.block_until_ready(fwd(xr, xi, params_f32))
    assert out_f32.shape == (B, C, H, W) and out_f32.dtype == jnp.complex64
    np.testing.assert_allclose(np.asarray(out_f32), ref, rtol=5e-4, atol=5e-4)

    # 2) bf16 production path (bf16 MXU inputs + bf16 inter-layer intermediate):
    #    checked with a relative-Frobenius error budget.
    params_bf16 = make_params(C, H, mxu_dtype=jnp.bfloat16)
    out_bf16 = jax.block_until_ready(fwd(xr, xi, params_bf16))
    assert out_bf16.shape == (B, C, H, W) and out_bf16.dtype == jnp.complex64
    err = (np.linalg.norm((np.asarray(out_bf16) - ref).ravel())
           / np.linalg.norm(ref.ravel()))
    assert err < 4e-2, f"bf16 relative error too large: {err}"

    print("KERNEL_OK")
</pallas_src>

<mosaic_0001>
module attributes {stable_mosaic.version = 11 : i64} {
  func.func @_cplx_dft_kernel(%arg0: i32, %arg1: i32, %arg2: memref<16x16xf32, #tpu.memory_space<vmem>>, %arg3: memref<16x16xf32, #tpu.memory_space<vmem>>, %arg4: memref<16x16xf32, #tpu.memory_space<vmem>>, %arg5: memref<1x16x32xf32, #tpu.memory_space<vmem>>, %arg6: memref<1x16x32xf32, #tpu.memory_space<vmem>>, %arg7: memref<1x16x32xf32, #tpu.memory_space<vmem>>, %arg8: memref<1x16x32xf32, #tpu.memory_space<vmem>>) attributes {dimension_semantics = [#tpu.dimension_semantics<parallel>, #tpu.dimension_semantics<parallel>], iteration_bounds = array<i64: 2, 1>, scalar_prefetch = 0 : i64, scratch_operands = 0 : i64, tpu.core_type = #tpu.core_type<tc>, window_params = [{pipeline_mode = #tpu.pipeline_mode<synchronous>, transform_indices = @transform_0, window_bounds = array<i64: 16, 16>}, {pipeline_mode = #tpu.pipeline_mode<synchronous>, transform_indices = @transform_1, window_bounds = array<i64: 16, 16>}, {pipeline_mode = #tpu.pipeline_mode<synchronous>, transform_indices = @transform_2, window_bounds = array<i64: 16, 16>}, {transform_indices = @transform_3, window_bounds = array<i64: 1, 16, 32>}, {transform_indices = @transform_4, window_bounds = array<i64: 1, 16, 32>}, {transform_indices = @transform_5, window_bounds = array<i64: 1, 16, 32>}, {transform_indices = @transform_6, window_bounds = array<i64: 1, 16, 32>}]} {
    %c0 = arith.constant 0 : index
    %c0_0 = arith.constant 0 : index
    %0 = vector.load %arg2[%c0, %c0_0] : memref<16x16xf32, #tpu.memory_space<vmem>>, vector<16x16xf32>
    %c0_1 = arith.constant 0 : index
    %c0_2 = arith.constant 0 : index
    %1 = vector.load %arg3[%c0_1, %c0_2] : memref<16x16xf32, #tpu.memory_space<vmem>>, vector<16x16xf32>
    %c0_3 = arith.constant 0 : index
    %c0_4 = arith.constant 0 : index
    %2 = vector.load %arg4[%c0_3, %c0_4] : memref<16x16xf32, #tpu.memory_space<vmem>>, vector<16x16xf32>
    %c0_5 = arith.constant 0 : index
    %c0_6 = arith.constant 0 : index
    %c0_7 = arith.constant 0 : index
    %3 = vector.load %arg5[%c0_5, %c0_6, %c0_7] : memref<1x16x32xf32, #tpu.memory_space<vmem>>, vector<1x16x32xf32>
    %4 = vector.shape_cast %3 : vector<1x16x32xf32> to vector<16x32xf32>
    %c0_8 = arith.constant 0 : index
    %c0_9 = arith.constant 0 : index
    %c0_10 = arith.constant 0 : index
    %5 = vector.load %arg6[%c0_8, %c0_9, %c0_10] : memref<1x16x32xf32, #tpu.memory_space<vmem>>, vector<1x16x32xf32>
    %6 = vector.shape_cast %5 : vector<1x16x32xf32> to vector<16x32xf32>
    %7 = arith.addf %4, %6 : vector<16x32xf32>
    %cst = arith.constant dense<0.000000e+00> : vector<16x32xf32>
    %8 = tpu.matmul %0, %4, %cst {dimension_numbers = #tpu.dot_dimension_numbers<[1], [0], [0], [1], [0, 0, 1, 1], [], []>} : vector<16x16xf32>, vector<16x32xf32>, vector<16x32xf32> -> vector<16x32xf32>
    %cst_11 = arith.constant dense<0.000000e+00> : vector<16x32xf32>
    %9 = tpu.matmul %1, %6, %cst_11 {dimension_numbers = #tpu.dot_dimension_numbers<[1], [0], [0], [1], [0, 0, 1, 1], [], []>} : vector<16x16xf32>, vector<16x32xf32>, vector<16x32xf32> -> vector<16x32xf32>
    %cst_12 = arith.constant dense<0.000000e+00> : vector<16x32xf32>
    %10 = tpu.matmul %2, %7, %cst_12 {dimension_numbers = #tpu.dot_dimension_numbers<[1], [0], [0], [1], [0, 0, 1, 1], [], []>} : vector<16x16xf32>, vector<16x32xf32>, vector<16x32xf32> -> vector<16x32xf32>
    %11 = arith.subf %8, %9 : vector<16x32xf32>
    %c0_13 = arith.constant 0 : index
    %c0_14 = arith.constant 0 : index
    %c0_15 = arith.constant 0 : index
    %12 = vector.load %arg7[%c0_13, %c0_14, %c0_15] : memref<1x16x32xf32, #tpu.memory_space<vmem>>, vector<1x16x32xf32>
    %13 = vector.shape_cast %12 : vector<1x16x32xf32> to vector<16x32xf32>
    %14 = vector.shape_cast %11 : vector<16x32xf32> to vector<1x16x32xf32>
    tpu.vector_store %arg7[%c0_13, %c0_14, %c0_15], %14 {strides = array<i32>} : memref<1x16x32xf32, #tpu.memory_space<vmem>>, vector<1x16x32xf32>,
    %15 = arith.subf %10, %8 : vector<16x32xf32>
    %16 = arith.subf %15, %9 : vector<16x32xf32>
    %c0_16 = arith.constant 0 : index
    %c0_17 = arith.constant 0 : index
    %c0_18 = arith.constant 0 : index
    %17 = vector.load %arg8[%c0_16, %c0_17, %c0_18] : memref<1x16x32xf32, #tpu.memory_space<vmem>>, vector<1x16x32xf32>
    %18 = vector.shape_cast %17 : vector<1x16x32xf32> to vector<16x32xf32>
    %19 = vector.shape_cast %16 : vector<16x32xf32> to vector<1x16x32xf32>
    tpu.vector_store %arg8[%c0_16, %c0_17, %c0_18], %19 {strides = array<i32>} : memref<1x16x32xf32, #tpu.memory_space<vmem>>, vector<1x16x32xf32>,
    return
  }
  func.func @transform_0(%arg0: i32, %arg1: i32) -> (i32, i32) {
    %c0_i32 = arith.constant 0 : i32
    %c0_i32_0 = arith.constant 0 : i32
    %c0_i32_1 = arith.constant 0 : i32
    return %c0_i32, %c0_i32_0 : i32, i32
  }
  func.func @transform_1(%arg0: i32, %arg1: i32) -> (i32, i32) {
    %c0_i32 = arith.constant 0 : i32
    %c0_i32_0 = arith.constant 0 : i32
    %c0_i32_1 = arith.constant 0 : i32
    return %c0_i32, %c0_i32_0 : i32, i32
  }
  func.func @transform_2(%arg0: i32, %arg1: i32) -> (i32, i32) {
    %c0_i32 = arith.constant 0 : i32
    %c0_i32_0 = arith.constant 0 : i32
    %c0_i32_1 = arith.constant 0 : i32
    return %c0_i32, %c0_i32_0 : i32, i32
  }
  func.func @transform_3(%arg0: i32, %arg1: i32) -> (i32, i32, i32) {
    %c0_i32 = arith.constant 0 : i32
    %c0_i32_0 = arith.constant 0 : i32
    return %arg0, %c0_i32, %arg1 : i32, i32, i32
  }
  func.func @transform_4(%arg0: i32, %arg1: i32) -> (i32, i32, i32) {
    %c0_i32 = arith.constant 0 : i32
    %c0_i32_0 = arith.constant 0 : i32
    return %arg0, %c0_i32, %arg1 : i32, i32, i32
  }
  func.func @transform_5(%arg0: i32, %arg1: i32) -> (i32, i32, i32) {
    %c0_i32 = arith.constant 0 : i32
    %c0_i32_0 = arith.constant 0 : i32
    return %arg0, %c0_i32, %arg1 : i32, i32, i32
  }
  func.func @transform_6(%arg0: i32, %arg1: i32) -> (i32, i32, i32) {
    %c0_i32 = arith.constant 0 : i32
    %c0_i32_0 = arith.constant 0 : i32
    return %arg0, %c0_i32, %arg1 : i32, i32, i32
  }
}

module attributes {stable_mosaic.version = 11 : i64} {
  func.func @_cplx_dft_kernel(%arg0: i32, %arg1: i32, %arg2: memref<8x8xf32, #tpu.memory_space<vmem>>, %arg3: memref<8x8xf32, #tpu.memory_space<vmem>>, %arg4: memref<8x8xf32, #tpu.memory_space<vmem>>, %arg5: memref<1x8x4xf32, #tpu.memory_space<vmem>>, %arg6: memref<1x8x4xf32, #tpu.memory_space<vmem>>, %arg7: memref<1x8x4xf32, #tpu.memory_space<vmem>>, %arg8: memref<1x8x4xf32, #tpu.memory_space<vmem>>) attributes {dimension_semantics = [#tpu.dimension_semantics<parallel>, #tpu.dimension_semantics<parallel>], iteration_bounds = array<i64: 32, 1>, scalar_prefetch = 0 : i64, scratch_operands = 0 : i64, tpu.core_type = #tpu.core_type<tc>, window_params = [{pipeline_mode = #tpu.pipeline_mode<synchronous>, transform_indices = @transform_0, window_bounds = array<i64: 8, 8>}, {pipeline_mode = #tpu.pipeline_mode<synchronous>, transform_indices = @transform_1, window_bounds = array<i64: 8, 8>}, {pipeline_mode = #tpu.pipeline_mode<synchronous>, transform_indices = @transform_2, window_bounds = array<i64: 8, 8>}, {transform_indices = @transform_3, window_bounds = array<i64: 1, 8, 4>}, {transform_indices = @transform_4, window_bounds = array<i64: 1, 8, 4>}, {transform_indices = @transform_5, window_bounds = array<i64: 1, 8, 4>}, {transform_indices = @transform_6, window_bounds = array<i64: 1, 8, 4>}]} {
    %c0 = arith.constant 0 : index
    %c0_0 = arith.constant 0 : index
    %0 = vector.load %arg2[%c0, %c0_0] : memref<8x8xf32, #tpu.memory_space<vmem>>, vector<8x8xf32>
    %c0_1 = arith.constant 0 : index
    %c0_2 = arith.constant 0 : index
    %1 = vector.load %arg3[%c0_1, %c0_2] : memref<8x8xf32, #tpu.memory_space<vmem>>, vector<8x8xf32>
    %c0_3 = arith.constant 0 : index
    %c0_4 = arith.constant 0 : index
    %2 = vector.load %arg4[%c0_3, %c0_4] : memref<8x8xf32, #tpu.memory_space<vmem>>, vector<8x8xf32>
    %c0_5 = arith.constant 0 : index
    %c0_6 = arith.constant 0 : index
    %c0_7 = arith.constant 0 : index
    %3 = vector.load %arg5[%c0_5, %c0_6, %c0_7] : memref<1x8x4xf32, #tpu.memory_space<vmem>>, vector<1x8x4xf32>
    %4 = vector.shape_cast %3 : vector<1x8x4xf32> to vector<8x4xf32>
    %c0_8 = arith.constant 0 : index
    %c0_9 = arith.constant 0 : index
    %c0_10 = arith.constant 0 : index
    %5 = vector.load %arg6[%c0_8, %c0_9, %c0_10] : memref<1x8x4xf32, #tpu.memory_space<vmem>>, vector<1x8x4xf32>
    %6 = vector.shape_cast %5 : vector<1x8x4xf32> to vector<8x4xf32>
    %7 = arith.addf %4, %6 : vector<8x4xf32>
    %cst = arith.constant dense<0.000000e+00> : vector<8x4xf32>
    %8 = tpu.matmul %0, %4, %cst {dimension_numbers = #tpu.dot_dimension_numbers<[1], [0], [0], [1], [0, 0, 1, 1], [], []>} : vector<8x8xf32>, vector<8x4xf32>, vector<8x4xf32> -> vector<8x4xf32>
    %cst_11 = arith.constant dense<0.000000e+00> : vector<8x4xf32>
    %9 = tpu.matmul %1, %6, %cst_11 {dimension_numbers = #tpu.dot_dimension_numbers<[1], [0], [0], [1], [0, 0, 1, 1], [], []>} : vector<8x8xf32>, vector<8x4xf32>, vector<8x4xf32> -> vector<8x4xf32>
    %cst_12 = arith.constant dense<0.000000e+00> : vector<8x4xf32>
    %10 = tpu.matmul %2, %7, %cst_12 {dimension_numbers = #tpu.dot_dimension_numbers<[1], [0], [0], [1], [0, 0, 1, 1], [], []>} : vector<8x8xf32>, vector<8x4xf32>, vector<8x4xf32> -> vector<8x4xf32>
    %11 = arith.subf %8, %9 : vector<8x4xf32>
    %c0_13 = arith.constant 0 : index
    %c0_14 = arith.constant 0 : index
    %c0_15 = arith.constant 0 : index
    %12 = vector.load %arg7[%c0_13, %c0_14, %c0_15] : memref<1x8x4xf32, #tpu.memory_space<vmem>>, vector<1x8x4xf32>
    %13 = vector.shape_cast %12 : vector<1x8x4xf32> to vector<8x4xf32>
    %14 = vector.shape_cast %11 : vector<8x4xf32> to vector<1x8x4xf32>
    tpu.vector_store %arg7[%c0_13, %c0_14, %c0_15], %14 {strides = array<i32>} : memref<1x8x4xf32, #tpu.memory_space<vmem>>, vector<1x8x4xf32>,
    %15 = arith.subf %10, %8 : vector<8x4xf32>
    %16 = arith.subf %15, %9 : vector<8x4xf32>
    %c0_16 = arith.constant 0 : index
    %c0_17 = arith.constant 0 : index
    %c0_18 = arith.constant 0 : index
    %17 = vector.load %arg8[%c0_16, %c0_17, %c0_18] : memref<1x8x4xf32, #tpu.memory_space<vmem>>, vector<1x8x4xf32>
    %18 = vector.shape_cast %17 : vector<1x8x4xf32> to vector<8x4xf32>
    %19 = vector.shape_cast %16 : vector<8x4xf32> to vector<1x8x4xf32>
    tpu.vector_store %arg8[%c0_16, %c0_17, %c0_18], %19 {strides = array<i32>} : memref<1x8x4xf32, #tpu.memory_space<vmem>>, vector<1x8x4xf32>,
    return
  }
  func.func @transform_0(%arg0: i32, %arg1: i32) -> (i32, i32) {
    %c0_i32 = arith.constant 0 : i32
    %c0_i32_0 = arith.constant 0 : i32
    %c0_i32_1 = arith.constant 0 : i32
    return %c0_i32, %c0_i32_0 : i32, i32
  }
  func.func @transform_1(%arg0: i32, %arg1: i32) -> (i32, i32) {
    %c0_i32 = arith.constant 0 : i32
    %c0_i32_0 = arith.constant 0 : i32
    %c0_i32_1 = arith.constant 0 : i32
    return %c0_i32, %c0_i32_0 : i32, i32
  }
  func.func @transform_2(%arg0: i32, %arg1: i32) -> (i32, i32) {
    %c0_i32 = arith.constant 0 : i32
    %c0_i32_0 = arith.constant 0 : i32
    %c0_i32_1 = arith.constant 0 : i32
    return %c0_i32, %c0_i32_0 : i32, i32
  }
  func.func @transform_3(%arg0: i32, %arg1: i32) -> (i32, i32, i32) {
    %c0_i32 = arith.constant 0 : i32
    %c0_i32_0 = arith.constant 0 : i32
    return %arg0, %c0_i32, %arg1 : i32, i32, i32
  }
  func.func @transform_4(%arg0: i32, %arg1: i32) -> (i32, i32, i32) {
    %c0_i32 = arith.constant 0 : i32
    %c0_i32_0 = arith.constant 0 : i32
    return %arg0, %c0_i32, %arg1 : i32, i32, i32
  }
  func.func @transform_5(%arg0: i32, %arg1: i32) -> (i32, i32, i32) {
    %c0_i32 = arith.constant 0 : i32
    %c0_i32_0 = arith.constant 0 : i32
    return %arg0, %c0_i32, %arg1 : i32, i32, i32
  }
  func.func @transform_6(%arg0: i32, %arg1: i32) -> (i32, i32, i32) {
    %c0_i32 = arith.constant 0 : i32
    %c0_i32_0 = arith.constant 0 : i32
    return %arg0, %c0_i32, %arg1 : i32, i32, i32
  }
}

</mosaic_0001>

<bundles_post_ra>
// kernel: custom-call
= control target key start
LH: loop header
LB: loop body
LE: loop exit
PB: predicated region body
PF: predicated region fallthrough
CT: control target
= control target key end

     0   :  { %s92_s0 = inlined_call_operand.vmem [shape: f32[2,16,8,4], index: 0, kind: input, shape index: {}]   ;;  %s93_s1 = inlined_call_operand.vmem [shape: f32[2,16,8,4], index: 1, kind: input, shape index: {}]   ;;  %s94_s2 = inlined_call_operand.hbm [shape: c64[2,16,8,4], index: 2, kind: output, shape index: {}]  }
   0x1   :  { %s3_s11 = scalar_lea.hbm %s94_s2, 1024 }
   0x2   :  { %4 = vsyncpa [#allocation0], 0  ;;  %s5_s14 = sshll.u32 %s92_s0, 4  ;;  %s6_s14 = int_to_ptr.vmem [resolvable:$true] %s5_s14 }
   0x3   :  { %s18_s15 = scalar_lea.vmem %s6_s14, 1024  ;;  %p23_p1 = scmp.lt.s32.totalorder %s6_s14, %s6_s14 }
   0x4   :  { %p19_p0 = scmp.ne.s32.totalorder %s6_s14, %s18_s15  ;;  %p24_p2 = scmp.lt.s32.totalorder %s18_s15, %s18_s15 }
   0x6   :  { %p25_p3 = por %p24_p2, %p23_p1 }
   0x8   :  { %p26_p4 = pnand %p25_p3, %p19_p0 }
   0xa   :  { %29 = shalt.err (!%p26_p4)  }
   0xb   :  { %8 = dma.vmem_to_hbm [thread:$0]  %s6_s14, 1024, %s94_s2, [#allocation0] }
   0xc   :  { %61 = dma.done.wait [#allocation0], 1024  }
   0xd   :  { %62 = vsyncadd [#allocation0], 4294966272 }
   0xe   :  { %10 = vsyncpa [#allocation0], 1 }
   0xf   :  { %11 = vsyncpa [#allocation1], 0  ;;  %s12_s0 = sshll.u32 %s93_s1, 4  ;;  %s13_s0 = int_to_ptr.vmem [resolvable:$true] %s12_s0 }
  0x10   :  { %s38_s20 = scalar_lea.vmem %s13_s0, 1024  ;;  %p43_p6 = scmp.lt.s32.totalorder %s13_s0, %s13_s0 }
  0x11   :  { %p39_p5 = scmp.ne.s32.totalorder %s13_s0, %s38_s20  ;;  %p44_p7 = scmp.lt.s32.totalorder %s38_s20, %s38_s20 }
  0x13   :  { %p45_p8 = por %p44_p7, %p43_p6 }
  0x15   :  { %p46_p9 = pnand %p45_p8, %p39_p5 }
  0x17   :  { %49 = shalt.err (!%p46_p9)  }
  0x18   :  { %15 = dma.vmem_to_hbm [thread:$0]  %s13_s0, 1024, %s3_s11, [#allocation1] }
  0x19   :  { %63 = dma.done.wait [#allocation1], 1024  }
  0x1a   :  { %64 = vsyncadd [#allocation1], 4294966272 }
  0x1b   :  { %17 = vsyncpa [#allocation1], 1 }

// kernel: signal_process_forward.2
= control target key start
LH: loop header
LB: loop body
LE: loop exit
PB: predicated region body
PF: predicated region fallthrough
CT: control target
= control target key end

     0   :  { %s891_s21 = smov 0   ;;  %s893_s22 = smov 0   ;;  %s960_s0 = inlined_call_operand.vmem [shape: f32[16,16], index: 0, kind: input, shape index: {}]   ;;  %s961_s1 = inlined_call_operand.vmem [shape: f32[16,16], index: 1, kind: input, shape index: {}]   ;;  %s962_s2 = inlined_call_operand.vmem [shape: f32[16,16], index: 2, kind: input, shape index: {}]   ;;  %s963_s3 = inlined_call_operand.vmem [shape: f32[2,16,32], index: 3, kind: input, shape index: {}]   ;;  %s964_s4 = inlined_call_operand.vmem [shape: f32[2,16,32], index: 4, kind: input, shape index: {}]   ;;  %s965_s5 = inlined_call_operand.vmem [shape: f32[2,16,32], index: 5, kind: output, shape index: {0}]   ;;  %s966_s6 = inlined_call_operand.vmem [shape: f32[2,16,32], index: 6, kind: output, shape index: {1}]  }
   0x1   :  { %s895_s23 = smov 0  }
   0x2 LB: > { %s29_s24 = sadd.s32 1, %s850_s22  ;;  %p754_p0 = scmp.ge.s32.totalorder %s854_s23, 1  ;;  %s854_s23 = sphi %s895_s23, %s17_s23   ;;  %s850_s22 = sphi %s893_s22, %s968_s22   ;;  %s846_s21 = sphi %s891_s21, %s967_s21  }
   0x3   : > { %p31_p1 = scmp.ge.s32.totalorder %s29_s24, 2  ;;  %p251_p2 = scmp.lt.s32.totalorder %s854_s23, 3 }
   0x5   : > { %s970_s24 = smov (%p31_p1, %s29_s24), 0  ;;  %p252_p3 = pnand %p754_p0, %p251_p2 }
   0x6   : > { %p303_p4 = scmp.lt.s32.totalorder (!%p252_p3), %s846_s21, 1 }
   0x7   : > { %255 = sbr.rel (%p252_p3) target bundleno = 225 (0xe1), region = 40 }
   0xc   : > { %v335_v0 = vld [vmem:[%s960_s0] sm:$0xff]  ;;  %vm347_vm0 = vcmask 130048   ;;  %s972_s21 = smov (!%p303_p4, %s846_s21), 1  ;;  %v336_v6 = vld [vmem:[%s960_s0 + $0x8] sm:$0xff]  ;;  %vm593_vm1 = vcmask 261120  }
   0xd   : > { %v337_v1 = vld [vmem:[%s961_s1] sm:$0xff]  ;;  %791 = vmatprep.mubr.msk.f32.mxu0 %vm347_vm0, %v335_v0  ;;  %s917_s29 = sshll.u32 %s972_s21, 4  ;;  %v338_v7 = vld [vmem:[%s961_s1 + $0x8] sm:$0xff] }
   0xe   : > { %798 = vmatprep.mubr.msk.f32.mxu1 %vm347_vm0, %v337_v1  ;;  %s310_s8 = scalar_lea.vmem %s963_s3, %s917_s29  ;;  %s318_s11 = scalar_lea.vmem %s964_s4, %s917_s29  ;;  %v339_v9 = vld [vmem:[%s962_s2] sm:$0xff]  ;;  %v340_v11 = vld [vmem:[%s962_s2 + $0x8] sm:$0xff] }
   0xf   : > { %v342_v2 = vld [vmem:[%s310_s8 + $0x8] sm:$0xff]  ;;  %v341_v4 = vld [vmem:[%s310_s8] sm:$0xff]  ;;  %s326_s25 = scalar_lea.vmem %s965_s5, %s917_s29  ;;  %s334_s28 = scalar_lea.vmem %s966_s6, %s917_s29 }
  0x10   : > { %v344_v3 = vld [vmem:[%s318_s11 + $0x8] sm:$0xff]  ;;  %787 = vmatprep.subr.mxu0 %v342_v2  ;;  %v343_v5 = vld [vmem:[%s318_s11] sm:$0xff] }
  0x11   : > { %794 = vmatprep.subr.mxu1 %v344_v3  ;;  %788 = vmatpush3.msra.mxu0 %v342_v2  ;;  %v346_v8 = vadd.f32 %v344_v3, %v342_v2  ;;  %v345_v10 = vadd.f32 %v343_v5, %v341_v4 }
  0x12   : > { %795 = vmatpush3.msra.mxu1 %v344_v3  ;;  %789 = vmatprep.subr.mxu0 %v341_v4 }
  0x13   : > { %796 = vmatprep.subr.mxu1 %v343_v5  ;;  %790 = vmatpush3.msra.mxu0 %v341_v4 }
  0x14   : > { %797 = vmatpush3.msra.mxu1 %v343_v5  ;;  %792 = vmatmul.mubr.msk.f32.vlgmr.msra.gmra.mxu0 %vm347_vm0, %v336_v6 }
  0x15   : > { %799 = vmatmul.mubr.msk.f32.vlgmr.msra.gmra.mxu1 %vm347_vm0, %v338_v7  ;;  %801 = vmatprep.subr.mxu0 %v346_v8 }
  0x16   : > { %805 = vmatprep.mubr.msk.f32.mxu0 %vm347_vm0, %v339_v9  ;;  %802 = vmatpush3.msra.mxu0 %v346_v8 }
  0x17   : > { %803 = vmatprep.subr.mxu0 %v345_v10 }
  0x18   : > { %804 = vmatpush3.msra.mxu0 %v345_v10 }
  0x19   : > { %806 = vmatmul.mubr.msk.f32.vlgmr.msra.gmra.mxu0 %vm347_vm0, %v340_v11 }
  0xd4   : > { %v793_v12 = vpop.f32.mrf.mxu0 }
  0xd5   : > { %v800_v13 = vpop.f32.mrf.mxu1 }
  0xd6   : > { %v592_v14 = vsub.f32 %v793_v12, %v800_v13  ;;  %v420_v15 = vpop.f32.mrf.mxu0 }
  0xd7   : > { %v501_v16 = vpop.f32.mrf.mxu1 }
  0xd8   : > { %595 = vst.msk [vmem:[%s326_s25 + $0x8] sm:$0xff] %vm593_vm1, %v592_v14  ;;  %v591_v17 = vsub.f32 %v420_v15, %v501_v16 }
  0xd9   : > { %v807_v18 = vpop.f32.mrf.mxu0 }
  0xda   : > { %594 = vst.msk [vmem:[%s326_s25] sm:$0xff] %vm593_vm1, %v591_v17  ;;  %v597_v19 = vsub.f32 %v807_v18, %v793_v12 }
  0xdb   : > { %v582_v20 = vpop.f32.mrf.mxu0 }
  0xdc   : > { %v599_v21 = vsub.f32 %v597_v19, %v800_v13  ;;  %v596_v22 = vsub.f32 %v582_v20, %v420_v15 }
  0xde   : > { %601 = vst.msk [vmem:[%s334_s28 + $0x8] sm:$0xff] %vm593_vm1, %v599_v21  ;;  %v598_v23 = vsub.f32 %v596_v22, %v501_v16 }
  0xe0   : > { %600 = vst.msk [vmem:[%s334_s28] sm:$0xff] %vm593_vm1, %v598_v23 }
  0xe1 PF: > { %s17_s23 = sadd.s32 1, %s854_s23   ;;  %s967_s21 = smov %s850_s22 }
  0xe2   : > { %p14_p5 = scmp.ge.s32.totalorder %s17_s23, 4   ;;  %s968_s22 = smov %s970_s24 }
  0xe4   :  { %16 = sbr.rel (!%p14_p5) target bundleno = 2 (0x2), region = 85 }

// kernel: signal_process_forward.3
= control target key start
LH: loop header
LB: loop body
LE: loop exit
PB: predicated region body
PF: predicated region fallthrough
CT: control target
= control target key end

     0   :  { %s809_s21 = smov 0   ;;  %s811_s22 = smov 0   ;;  %s866_s0 = inlined_call_operand.vmem [shape: f32[8,8], index: 0, kind: input, shape index: {}]   ;;  %s867_s1 = inlined_call_operand.vmem [shape: f32[8,8], index: 1, kind: input, shape index: {}]   ;;  %s868_s2 = inlined_call_operand.vmem [shape: f32[8,8], index: 2, kind: input, shape index: {}]   ;;  %s869_s3 = inlined_call_operand.vmem [shape: f32[32,8,4], index: 3, kind: input, shape index: {}]   ;;  %s870_s4 = inlined_call_operand.vmem [shape: f32[32,8,4], index: 4, kind: input, shape index: {}]   ;;  %s871_s5 = inlined_call_operand.vmem [shape: f32[32,8,4], index: 5, kind: output, shape index: {0}]   ;;  %s872_s6 = inlined_call_operand.vmem [shape: f32[32,8,4], index: 6, kind: output, shape index: {1}]  }
   0x1   :  { %s813_s23 = smov 0  }
   0x2 LB: > { %s29_s24 = sadd.s32 1, %s766_s22  ;;  %p691_p0 = scmp.ge.s32.totalorder %s770_s23, 1  ;;  %s770_s23 = sphi %s813_s23, %s17_s23   ;;  %s766_s22 = sphi %s811_s22, %s874_s22   ;;  %s762_s21 = sphi %s809_s21, %s873_s21  }
   0x3   : > { %p31_p1 = scmp.ge.s32.totalorder %s29_s24, 32  ;;  %p249_p2 = scmp.lt.s32.totalorder %s770_s23, 33 }
   0x5   : > { %s876_s24 = smov (%p31_p1, %s29_s24), 0  ;;  %p250_p3 = pnand %p691_p0, %p249_p2 }
   0x6   : > { %p297_p4 = scmp.lt.s32.totalorder (!%p250_p3), %s762_s21, 31 }
   0x7   : > { %253 = sbr.rel (%p250_p3) target bundleno = 219 (0xdb), region = 40 }
   0xc   : > { %v772_v0 = vmov 0.0   ;;  %vm773_vm0 = vmmov 0   ;;  %s878_s21 = smov (!%p297_p4, %s762_s21), 31  ;;  %v325_v1 = vld [vmem:[%s866_s0] sm:$0xff]  ;;  %vm331_vm1 = vcmask 64512   ;;  %vm552_vm2 = vcmask 31744  }
   0xd   : > { %707 = vmatprep.subr.mxu0 %v772_v0  ;;  %709 = vmatprep.mubr.msk.f32.mxu0 %vm773_vm0, %v772_v0  ;;  %s829_s25 = sshll.u32 %s878_s21, 3  ;;  %v326_v3 = vld [vmem:[%s867_s1] sm:$0xff] }
   0xe   : > { %712 = vmatprep.subr.mxu1 %v772_v0  ;;  %714 = vmatprep.mubr.msk.f32.mxu1 %vm773_vm0, %v772_v0  ;;  %s303_s28 = scalar_lea.vmem %s869_s3, %s829_s25  ;;  %s310_s9 = scalar_lea.vmem %s870_s4, %s829_s25  ;;  %v327_v6 = vld [vmem:[%s868_s2] sm:$0xff] }
   0xf   : > { %v328_v2 = vld [vmem:[%s303_s28] sm:$0xff]  ;;  %s317_s16 = scalar_lea.vmem %s871_s5, %s829_s25  ;;  %s324_s19 = scalar_lea.vmem %s872_s6, %s829_s25 }
  0x10   : > { %708 = vmatpush3.msra.mxu0 %v328_v2  ;;  %v329_v4 = vld [vmem:[%s310_s9] sm:$0xff] }
  0x11   : > { %710 = vmatmul.mubr.msk.f32.vlgmr.msra.gmra.mxu0 %vm331_vm1, %v325_v1  ;;  %v330_v5 = vadd.f32 %v329_v4, %v328_v2  ;;  %713 = vmatpush3.msra.mxu1 %v329_v4 }
  0x12   : > { %717 = vmatprep.subr.mxu0 %v772_v0  ;;  %715 = vmatmul.mubr.msk.f32.vlgmr.msra.gmra.mxu1 %vm331_vm1, %v326_v3 }
  0x13   : > { %718 = vmatpush3.msra.mxu0 %v330_v5  ;;  %719 = vmatprep.mubr.msk.f32.mxu0 %vm773_vm0, %v772_v0 }
  0x15   : > { %720 = vmatmul.mubr.msk.f32.vlgmr.msra.gmra.mxu0 %vm331_vm1, %v327_v6 }
  0xd1   : > { %v401_v7 = vpop.f32.mrf.mxu0 }
  0xd2   : > { %v474_v8 = vpop.f32.mrf.mxu1 }
  0xd3   : > { %v551_v9 = vsub.f32 %v401_v7, %v474_v8  ;;  %v711_v10 = vpop.f32.mrf.mxu0 }
  0xd4   : > { %v716_v11 = vpop.f32.mrf.mxu1 }
  0xd5   : > { %553 = vst.msk [vmem:[%s317_s16] sm:$0xff] %vm552_vm2, %v551_v9  ;;  %v547_v12 = vpop.f32.mrf.mxu0 }
  0xd6   : > { %v554_v13 = vsub.f32 %v547_v12, %v401_v7 }
  0xd7   : > { %v721_v14 = vpop.f32.mrf.mxu0 }
  0xd8   : > { %v555_v15 = vsub.f32 %v554_v13, %v474_v8 }
  0xda   : > { %556 = vst.msk [vmem:[%s324_s19] sm:$0xff] %vm552_vm2, %v555_v15 }
  0xdb PF: > { %s17_s23 = sadd.s32 1, %s770_s23   ;;  %s873_s21 = smov %s766_s22 }
  0xdc   : > { %p14_p5 = scmp.ge.s32.totalorder %s17_s23, 34   ;;  %s874_s22 = smov %s876_s24 }
  0xde   :  { %16 = sbr.rel (!%p14_p5) target bundleno = 2 (0x2), region = 85 }

</bundles_post_ra>
